<compile_context>
chip_gen: v7x
topology: tpu7x:2x2x1
jax: 0.10.0
libtpu: 0.0.40
codegen_flags: <defaults>
</compile_context>

<pallas_src>
import jax
import jax.numpy as jnp
from jax.experimental import pallas as pl
from jax.experimental.pallas import tpu as pltpu

EPS_LN = 1e-5    # torch.nn.LayerNorm default eps
EPS_AGG = 1e-6   # denominator eps in the gating aggregation
ROW_TILE_TARGET = 1024


def _round_up(x, m):
    return ((x + m - 1) // m) * m


def _pick_tile(size, target, mult):
    """Return (tile, padded_size): full (rounded) size when small, else a
    target-sized tile (multiple of `mult`, and of 128 when target >= 128)."""
    if size <= target:
        p = _round_up(size, mult)
        return p, p
    t = _round_up(target, mult)
    return t, _round_up(size, t)


def _vmem_limit_bytes():
    """Generation-aware VMEM budget: ~half of physical VMEM, clamped.
    v5e/v6e (128 MiB) -> 64 MiB; v7x (64 MiB) -> 32 MiB; unknown -> 32 MiB."""
    try:
        cap = int(pltpu.get_tpu_info().vmem_capacity_bytes)
        return max(32 * 1024 * 1024, min(cap // 2, 96 * 1024 * 1024))
    except Exception:
        return 32 * 1024 * 1024


def _layernorm(x, gamma, beta):
    mu = jnp.mean(x, axis=-1, keepdims=True)
    xc = x - mu
    var = jnp.mean(xc * xc, axis=-1, keepdims=True)
    inv = jax.lax.rsqrt(var + EPS_LN)
    return xc * inv * gamma + beta


def _silu(x):
    return x * jax.nn.sigmoid(x)


# ---------------------------------------------------------------------------
# Kernel 1: fused node-side projections (single [D, 4D] matmul, lane-dense out)
#           output columns: [ e_src | Bh | e_dst | Uh ]
# ---------------------------------------------------------------------------
def node_proj_kernel(h_ref, w4_ref, b4_ref, proj_ref):
    proj_ref[...] = (
        jnp.dot(h_ref[...], w4_ref[...], preferred_element_type=jnp.float32)
        + b4_ref[...]
    )


# ---------------------------------------------------------------------------
# Kernel 2: edge update (edge gate, u_add_v, LayerNorm, SiLU, residual, sigma,
#           u_mul_e message) -> one lane-dense slab [sigma | Bh[src]*sigma | y | 0]
# ---------------------------------------------------------------------------
def edge_kernel(srcpack_ref, edstg_ref, ef_ref,
                weg_ref, beg_ref, gamma_ref, beta_ref,
                slab_ref):
    d = ef_ref.shape[-1]
    sp = srcpack_ref[...]          # [te, 2D] = [ e_src[u] | Bh[u] ]
    e_src_g = sp[:, :d]
    bh_src = sp[:, d:]
    ef = ef_ref[...]
    m = (e_src_g + edstg_ref[...]
         + jnp.dot(ef, weg_ref[...], preferred_element_type=jnp.float32)
         + beg_ref[...])
    y = ef + _silu(_layernorm(m, gamma_ref[...], beta_ref[...]))
    sigma = jax.nn.sigmoid(y)
    # single 4D-wide (128-lane at D=32) unmasked store
    slab_ref[...] = jnp.concatenate(
        [sigma, bh_src * sigma, y, jnp.zeros_like(y)], axis=-1)


# ---------------------------------------------------------------------------
# Kernel 3: incoming-edge segment sums via an in-register incidence mask built
#           from the dst indices (no [N, E] one-hot in HBM), accumulated over
#           the E grid axis, followed by the node update.
# ---------------------------------------------------------------------------
def node_agg_kernel(dst_ref, slab_ref, proj_ref, hin_ref, gamma_ref, beta_ref,
                    x_ref, acc_ref):
    i = pl.program_id(0)
    e = pl.program_id(1)
    tm = acc_ref.shape[0]
    te = slab_ref.shape[0]
    d = hin_ref.shape[-1]

    @pl.when(e == 0)
    def _():
        acc_ref[...] = jnp.zeros_like(acc_ref)

    # Build the [tm, te] dst-incidence mask in-registers from the raw indices.
    row_ids = jax.lax.broadcasted_iota(jnp.int32, (tm, te), 0) + i * tm
    dst_tile = dst_ref[...]                              # (1, te) int32
    mask = jnp.where(row_ids == dst_tile, jnp.float32(1.0), jnp.float32(0.0))

    # One MXU matmul accumulates sum_sigma and sum_sigma_h (full 4D-wide slab
    # keeps the MXU output 128 lanes wide and avoids a pre-matmul lane slice).
    acc_ref[...] += jnp.dot(mask, slab_ref[...],
                            preferred_element_type=jnp.float32)

    @pl.when(e == pl.num_programs(1) - 1)
    def _():
        acc = acc_ref[...]
        sum_sigma = acc[:, :d]
        sum_sigma_h = acc[:, d:2 * d]
        h_agg = sum_sigma_h / (sum_sigma + EPS_AGG)
        uh = proj_ref[...][:, 3 * d:]                    # Uh columns of proj
        x = uh + h_agg
        x_ref[...] = hin_ref[...] + _silu(
            _layernorm(x, gamma_ref[...], beta_ref[...]))


# ---------------------------------------------------------------------------
# Wrapper
# ---------------------------------------------------------------------------
def edge_gated_graph_conv(params, src, dst, node_feats, edge_feats):
    f32 = jnp.float32
    N, D = node_feats.shape
    E = edge_feats.shape[0]

    vmem_limit = _vmem_limit_bytes()
    tm, Np = _pick_tile(N, ROW_TILE_TARGET, 8)   # node-row tile / padded nodes
    te, Ep = _pick_tile(E, ROW_TILE_TARGET, 8)   # edge-row tile / padded edges

    # pad to tile multiples (no-ops when already aligned)
    h = node_feats if Np == N else jnp.pad(node_feats, ((0, Np - N), (0, 0)))
    ef = edge_feats if Ep == E else jnp.pad(edge_feats, ((0, Ep - E), (0, 0)))
    src_p = src if Ep == E else jnp.pad(src, (0, Ep - E), constant_values=0)
    # padded dst edges point out-of-range: their in-kernel incidence-mask
    # column is all zero (the XLA gather below clips them; result discarded).
    dst_p = dst if Ep == E else jnp.pad(dst, (0, Ep - E), constant_values=Np)

    # ---- fused node projections: columns [e_src | Bh | e_dst | Uh] ----
    w4 = jnp.concatenate([params["w_src_gate"], params["w_dst_update"],
                          params["w_dst_gate"], params["w_src_update"]], axis=1)
    b4 = jnp.concatenate([params["b_src_gate"], params["b_dst_update"],
                          params["b_dst_gate"], params["b_src_update"]], axis=1)

    proj = pl.pallas_call(
        node_proj_kernel,
        grid=(Np // tm,),
        in_specs=[
            pl.BlockSpec((tm, D), lambda i: (i, 0)),
            pl.BlockSpec((D, 4 * D), lambda i: (0, 0)),
            pl.BlockSpec((1, 4 * D), lambda i: (0, 0)),
        ],
        out_specs=pl.BlockSpec((tm, 4 * D), lambda i: (i, 0)),
        out_shape=jax.ShapeDtypeStruct((Np, 4 * D), f32),
        compiler_params=pltpu.CompilerParams(
            dimension_semantics=("parallel",),
            vmem_limit_bytes=vmem_limit),
        cost_estimate=pl.CostEstimate(
            flops=2 * Np * D * 4 * D,
            transcendentals=0,
            bytes_accessed=4 * (Np * D + 4 * D * D + 4 * D + Np * 4 * D)),
    )(h, w4, b4)

    # TODO(synk): these two row-gathers still run as XLA ops; replace with an
    #             in-kernel gather / sorted-edge segment offsets when available.
    src_pack = jnp.take(proj[:, :2 * D], src_p, axis=0)       # [Ep, 2D]
    e_dst_g = jnp.take(proj[:, 2 * D:3 * D], dst_p, axis=0)   # [Ep, D]

    # ---- edge update -> lane-dense slab [sigma | Bh[src]*sigma | y | 0] ----
    slab = pl.pallas_call(
        edge_kernel,
        grid=(Ep // te,),
        in_specs=[
            pl.BlockSpec((te, 2 * D), lambda i: (i, 0)),
            pl.BlockSpec((te, D), lambda i: (i, 0)),
            pl.BlockSpec((te, D), lambda i: (i, 0)),
            pl.BlockSpec((D, D), lambda i: (0, 0)),
            pl.BlockSpec((1, D), lambda i: (0, 0)),
            pl.BlockSpec((1, D), lambda i: (0, 0)),
            pl.BlockSpec((1, D), lambda i: (0, 0)),
        ],
        out_specs=pl.BlockSpec((te, 4 * D), lambda i: (i, 0)),
        out_shape=jax.ShapeDtypeStruct((Ep, 4 * D), f32),
        compiler_params=pltpu.CompilerParams(
            dimension_semantics=("parallel",),
            vmem_limit_bytes=vmem_limit),
        cost_estimate=pl.CostEstimate(
            flops=2 * Ep * D * D + 24 * Ep * D,
            transcendentals=3 * Ep * D,
            bytes_accessed=4 * (Ep * 4 * D + Ep * 4 * D + D * D + 4 * D)),
    )(src_pack, e_dst_g, ef,
      params["w_edge_gate"], params["b_edge_gate"],
      params["gamma_edges"], params["beta_edges"])

    # ---- node aggregation + node update (tiled reduction over E) ----
    dst_row = dst_p.astype(jnp.int32).reshape(1, Ep)
    n_node_tiles = Np // tm

    x_p = pl.pallas_call(
        node_agg_kernel,
        grid=(n_node_tiles, Ep // te),
        in_specs=[
            pl.BlockSpec((1, te), lambda i, e: (0, e)),       # dst indices
            pl.BlockSpec((te, 4 * D), lambda i, e: (e, 0)),   # [sigma|msg|y|0]
            pl.BlockSpec((tm, 4 * D), lambda i, e: (i, 0)),   # proj (Uh cols)
            pl.BlockSpec((tm, D), lambda i, e: (i, 0)),       # h_in (residual)
            pl.BlockSpec((1, D), lambda i, e: (0, 0)),
            pl.BlockSpec((1, D), lambda i, e: (0, 0)),
        ],
        out_specs=pl.BlockSpec((tm, D), lambda i, e: (i, 0)),
        out_shape=jax.ShapeDtypeStruct((Np, D), f32),
        scratch_shapes=[pltpu.VMEM((tm, 4 * D), jnp.float32)],
        compiler_params=pltpu.CompilerParams(
            dimension_semantics=("parallel", "arbitrary"),
            vmem_limit_bytes=vmem_limit),
        cost_estimate=pl.CostEstimate(
            flops=2 * Np * Ep * 4 * D + Np * Ep + 14 * Np * D,
            transcendentals=2 * Np * D,
            bytes_accessed=n_node_tiles * 4 * (Ep + Ep * 4 * D)
            + 4 * (Np * 4 * D + 2 * Np * D + 2 * D)),
    )(dst_row, slab, proj, h,
      params["gamma_nodes"], params["beta_nodes"])

    x = x_p if Np == N else x_p[:N]
    y = slab[:E, 2 * D:3 * D]
    return x, y


# ---------------------------------------------------------------------------
# Pure-JAX reference (same math) for a sanity check
# ---------------------------------------------------------------------------
def reference(params, src, dst, node_feats, edge_feats):
    p = params
    e_src = node_feats @ p["w_src_gate"] + p["b_src_gate"]
    e_dst = node_feats @ p["w_dst_gate"] + p["b_dst_gate"]
    uh = node_feats @ p["w_src_update"] + p["b_src_update"]
    bh = node_feats @ p["w_dst_update"] + p["b_dst_update"]
    m = e_src[src] + e_dst[dst] + edge_feats @ p["w_edge_gate"] + p["b_edge_gate"]
    y = edge_feats + _silu(_layernorm(m, p["gamma_edges"], p["beta_edges"]))
    sigma = jax.nn.sigmoid(y)
    N = node_feats.shape[0]
    sum_sigma_h = jax.ops.segment_sum(bh[src] * sigma, dst, num_segments=N)
    sum_sigma = jax.ops.segment_sum(sigma, dst, num_segments=N)
    h = sum_sigma_h / (sum_sigma + EPS_AGG)
    x = uh + h
    x = node_feats + _silu(_layernorm(x, p["gamma_nodes"], p["beta_nodes"]))
    return x, y


def init_params(key, d):
    # torch Linear weights are [out, in]; stored pre-transposed [in, out]
    # so kernels compute x @ W. Deterministic synthetic init.
    ks = jax.random.split(key, 10)
    scale = 0.1

    def lin(kw, kb):
        w = scale * jax.random.normal(kw, (d, d), jnp.float32)
        b = scale * jax.random.normal(kb, (1, d), jnp.float32)
        return w, b

    w_sg, b_sg = lin(ks[0], ks[1])
    w_dg, b_dg = lin(ks[2], ks[3])
    w_eg, b_eg = lin(ks[4], ks[5])
    w_su, b_su = lin(ks[6], ks[7])
    w_du, b_du = lin(ks[8], ks[9])
    return dict(
        w_src_gate=w_sg, b_src_gate=b_sg,
        w_dst_gate=w_dg, b_dst_gate=b_dg,
        w_edge_gate=w_eg, b_edge_gate=b_eg,
        w_src_update=w_su, b_src_update=b_su,
        w_dst_update=w_du, b_dst_update=b_du,
        gamma_edges=jnp.ones((1, d), jnp.float32),
        beta_edges=jnp.zeros((1, d), jnp.float32),
        gamma_nodes=jnp.ones((1, d), jnp.float32),
        beta_nodes=jnp.zeros((1, d), jnp.float32),
    )


if __name__ == "__main__":
    N, E, D = 16, 32, 32  # input_features == output_features (residual connections)
    key = jax.random.PRNGKey(0)
    k_nodes, k_edges, k_src, k_dst, k_params = jax.random.split(key, 5)

    node_feats = jax.random.normal(k_nodes, (N, D), jnp.float32)
    edge_feats = jax.random.normal(k_edges, (E, D), jnp.float32)
    src = jax.random.randint(k_src, (E,), 0, N, jnp.int32)
    dst = jax.random.randint(k_dst, (E,), 0, N, jnp.int32)
    params = init_params(k_params, D)

    x, y = edge_gated_graph_conv(params, src, dst, node_feats, edge_feats)
    x = jax.block_until_ready(x)
    y = jax.block_until_ready(y)

    x_ref, y_ref = reference(params, src, dst, node_feats, edge_feats)
    assert jnp.allclose(x, x_ref, atol=1e-4, rtol=1e-4), "node output mismatch"
    assert jnp.allclose(y, y_ref, atol=1e-4, rtol=1e-4), "edge output mismatch"

    print("KERNEL_OK")
</pallas_src>

<mosaic_0001>
module attributes {stable_mosaic.version = 11 : i64} {
  func.func @node_proj_kernel(%arg0: i32, %arg1: memref<16x32xf32, #tpu.memory_space<vmem>>, %arg2: memref<32x128xf32, #tpu.memory_space<vmem>>, %arg3: memref<1x128xf32, #tpu.memory_space<vmem>>, %arg4: memref<16x128xf32, #tpu.memory_space<vmem>>) attributes {dimension_semantics = [#tpu.dimension_semantics<parallel>], iteration_bounds = array<i64: 1>, scalar_prefetch = 0 : i64, scratch_operands = 0 : i64, tpu.core_type = #tpu.core_type<tc>, window_params = [{transform_indices = @transform_0, window_bounds = array<i64: 16, 32>}, {pipeline_mode = #tpu.pipeline_mode<synchronous>, transform_indices = @transform_1, window_bounds = array<i64: 32, 128>}, {pipeline_mode = #tpu.pipeline_mode<synchronous>, transform_indices = @transform_2, window_bounds = array<i64: 1, 128>}, {transform_indices = @transform_3, window_bounds = array<i64: 16, 128>}]} {
    %c0 = arith.constant 0 : index
    %c0_0 = arith.constant 0 : index
    %0 = vector.load %arg1[%c0, %c0_0] : memref<16x32xf32, #tpu.memory_space<vmem>>, vector<16x32xf32>
    %c0_1 = arith.constant 0 : index
    %c0_2 = arith.constant 0 : index
    %1 = vector.load %arg2[%c0_1, %c0_2] : memref<32x128xf32, #tpu.memory_space<vmem>>, vector<32x128xf32>
    %cst = arith.constant dense<0.000000e+00> : vector<16x128xf32>
    %2 = tpu.matmul %0, %1, %cst {dimension_numbers = #tpu.dot_dimension_numbers<[1], [0], [0], [1], [0, 0, 1, 1], [], []>} : vector<16x32xf32>, vector<32x128xf32>, vector<16x128xf32> -> vector<16x128xf32>
    %c0_3 = arith.constant 0 : index
    %c0_4 = arith.constant 0 : index
    %3 = vector.load %arg3[%c0_3, %c0_4] : memref<1x128xf32, #tpu.memory_space<vmem>>, vector<1x128xf32>
    %4 = vector.broadcast %3 : vector<1x128xf32> to vector<16x128xf32>
    %5 = arith.addf %2, %4 : vector<16x128xf32>
    %c0_5 = arith.constant 0 : index
    %c0_6 = arith.constant 0 : index
    %6 = vector.load %arg4[%c0_5, %c0_6] : memref<16x128xf32, #tpu.memory_space<vmem>>, vector<16x128xf32>
    tpu.vector_store %arg4[%c0_5, %c0_6], %5 {strides = array<i32>} : memref<16x128xf32, #tpu.memory_space<vmem>>, vector<16x128xf32>,
    return
  }
  func.func @transform_0(%arg0: i32) -> (i32, i32) {
    %c0_i32 = arith.constant 0 : i32
    %c0_i32_0 = arith.constant 0 : i32
    return %arg0, %c0_i32 : i32, i32
  }
  func.func @transform_1(%arg0: i32) -> (i32, i32) {
    %c0_i32 = arith.constant 0 : i32
    %c0_i32_0 = arith.constant 0 : i32
    %c0_i32_1 = arith.constant 0 : i32
    return %c0_i32, %c0_i32_0 : i32, i32
  }
  func.func @transform_2(%arg0: i32) -> (i32, i32) {
    %c0_i32 = arith.constant 0 : i32
    %c0_i32_0 = arith.constant 0 : i32
    %c0_i32_1 = arith.constant 0 : i32
    return %c0_i32, %c0_i32_0 : i32, i32
  }
  func.func @transform_3(%arg0: i32) -> (i32, i32) {
    %c0_i32 = arith.constant 0 : i32
    %c0_i32_0 = arith.constant 0 : i32
    return %arg0, %c0_i32 : i32, i32
  }
}

</mosaic_0001>

<bundles_post_ra>
// kernel: tpu_custom_call.1
= control target key start
LH: loop header
LB: loop body
LE: loop exit
PB: predicated region body
PF: predicated region fallthrough
CT: control target
= control target key end

     0   :  { %8 = vsyncpa [#allocation3], 0  ;;  %s336_s0 = inlined_call_operand.hbm [shape: f32[16,32], index: 0, kind: input, shape index: {}]   ;;  %s337_s1 = inlined_call_operand.hbm [shape: f32[32,128], index: 1, kind: input, shape index: {}]   ;;  %s338_s2 = inlined_call_operand.vmem [shape: f32[1,128], index: 2, kind: input, shape index: {}]   ;;  %s339_s3 = inlined_call_operand.hbm [shape: f32[16,128], index: 3, kind: output, shape index: {}]  }
   0x1   :  { %9 = vsyncpa [#allocation6], 0 }
   0x2   :  { %10 = vsyncpa [#allocation4], 0  ;;  %s263_s12 = smov [#allocation2]   ;;  %s191_s16 = scalar_lea.hbm %s336_s0, 256 }
   0x3   :  { %s16_s13 = sshll.u32 %s263_s12, 4  ;;  %p192_p0 = scmp.ne.s32.totalorder %s336_s0, %s191_s16  ;;  %s17_s13 = int_to_ptr.vmem [resolvable:$true] %s16_s13 }
   0x4   :  { %p195_p1 = scmp.lt.u32.totalorder %s191_s16, %s336_s0 }
   0x6   :  { %p197_p2 = pnand %p195_p1, %p192_p0 }
   0x8   :  { %200 = shalt.err (!%p197_p2)
}
   0x9   :  { %s201_s21 = scalar_lea.vmem %s17_s13, 256  ;;  %p206_p4 = scmp.lt.s32.totalorder %s17_s13, %s17_s13 }
   0xa   :  { %p202_p3 = scmp.ne.s32.totalorder %s17_s13, %s201_s21  ;;  %p207_p5 = scmp.lt.s32.totalorder %s201_s21, %s201_s21 }
   0xc   :  { %p208_p6 = por %p207_p5, %p206_p4 }
   0xe   :  { %p209_p7 = pnand %p208_p6, %p202_p3 }
  0x10   :  { %212 = shalt.err (!%p209_p7)
}
  0x11   :  { %s264_s22 = smov 128   ;;  %s265_s23 = smov 8  }
  0x12   :  { %22 = dma.hbm_to_vmem [thread:$0]  %s336_s0, 256, %s17_s13, [#allocation3], %s264_s22, %s264_s22, %s265_s23  }
  0x13   :  { %s266_s26 = smov [#allocation5]   ;;  %s213_s30 = scalar_lea.hbm %s337_s1, 512 }
  0x14   :  { %s28_s27 = sshll.u32 %s266_s26, 4  ;;  %p214_p8 = scmp.ne.s32.totalorder %s337_s1, %s213_s30  ;;  %s29_s27 = int_to_ptr.vmem [resolvable:$true] %s28_s27 }
  0x15   :  { %p217_p9 = scmp.lt.u32.totalorder %s213_s30, %s337_s1 }
  0x17   :  { %p219_p10 = pnand %p217_p9, %p214_p8 }
  0x19   :  { %222 = shalt.err (!%p219_p10)
}
  0x1a   :  { %s223_s8 = scalar_lea.vmem %s29_s27, 512  ;;  %p228_p12 = scmp.lt.s32.totalorder %s29_s27, %s29_s27 }
  0x1b   :  { %p224_p11 = scmp.ne.s32.totalorder %s29_s27, %s223_s8  ;;  %p229_p13 = scmp.lt.s32.totalorder %s223_s8, %s223_s8 }
  0x1d   :  { %p230_p0 = por %p229_p13, %p228_p12 }
  0x1f   :  { %p231_p1 = pnand %p230_p0, %p224_p11 }
  0x21   :  { %234 = shalt.err (!%p231_p1)
}
  0x22   :  { %34 = dma.hbm_to_vmem [thread:$0]  %s337_s1, 512, %s29_s27, [#allocation6], %s264_s22, %s264_s22, %s265_s23  }
  0x23   :  { %257 = dma.done.wait [#allocation3], 256  }
  0x24   :  { %258 = vsyncadd [#allocation3], 4294967040 }
  0x25   :  { %259 = dma.done.wait [#allocation6], 512  }
  0x26   :  { %260 = vsyncadd [#allocation6], 4294966784  ;;  %vm56_vm0 = vcmask 261120   ;;  %v45_v0 = vld [vmem:[#allocation5] sm:$0xff]  ;;  %v46_v1 = vld [vmem:[#allocation5 + $0x8] sm:$0xff]  ;;  %s267_s11 = smov [#allocation7]  }
  0x27   :  { %v47_v2 = vld [vmem:[#allocation5 + $0x10] sm:$0xff]  ;;  %v178_v3 = vpack.c.bf16 %v46_v1, %v45_v0  ;;  %v48_v4 = vld [vmem:[#allocation5 + $0x18] sm:$0xff]  ;;  %s145_s12 = sshll.u32 %s267_s11, 4  ;;  %s146_s12 = int_to_ptr.vmem [resolvable:$true] %s145_s12 }
  0x28   :  { %v43_v5 = vld [vmem:[#allocation2] sm:$0xff]  ;;  %v182_v6 = vpack.c.bf16 %v48_v4, %v47_v2  ;;  %v44_v7 = vld [vmem:[#allocation2 + $0x8] sm:$0xff]  ;;  %s235_s13 = scalar_lea.vmem %s146_s12, 256  ;;  %p240_p3 = scmp.lt.s32.totalorder %s146_s12, %s146_s12 }
  0x29   :  { %175 = vmatprep.mubr.msk.f32.mxu0 %vm56_vm0, %v43_v5  ;;  %179 = vmatprep.subr.bf16.mxu0 %v178_v3  ;;  %v158_v8 = vld [vmem:[%s338_s2] ss:$0 sm:$0xff]  ;;  %p236_p2 = scmp.ne.s32.totalorder %s146_s12, %s235_s13  ;;  %p241_p4 = scmp.lt.s32.totalorder %s235_s13, %s235_s13 }
  0x2a   :  { %181 = vmatpush3.bf16.msra.mxu0 %v178_v3 }
  0x2b   :  { %183 = vmatprep.subr.bf16.mxu0 %v182_v6  ;;  %p242_p5 = por %p241_p4, %p240_p3 }
  0x2d   :  { %p243_p6 = pnand %p242_p5, %p236_p2 }
  0x2e   :  { %185 = vmatpush3.bf16.msra.mxu0 %v182_v6 }
  0x31   :  { %176 = vmatmul.mubr.msk.f32.vlgmr.msra.gmra.mrb[0].mxu0 %vm56_vm0, %v44_v7 }
 0x104   :  { %v177_v9 = vpop.f32.mrb[0].mxu0 }
 0x105   :  { %v135_v10 = vadd.f32 %v177_v9, %v158_v8  ;;  %v129_v11 = vpop.f32.mrb[1].mxu0 }
 0x106   :  { %v130_v12 = vadd.f32 %v158_v8, %v129_v11 }
 0x107   :  { %139 = vst [vmem:[#allocation7 + $0x8] sm:$0xff] %v135_v10 }
 0x108   :  { %138 = vst [vmem:[#allocation7] sm:$0xff] %v130_v12 }
 0x109   :  { %246 = shalt.err (!%p243_p6)
}
 0x10a   :  { %s247_s2 = scalar_lea.hbm %s339_s3, 256 }
 0x10b   :  { %p248_p7 = scmp.ne.s32.totalorder %s339_s3, %s247_s2  ;;  %p251_p8 = scmp.lt.u32.totalorder %s247_s2, %s339_s3 }
 0x10d   :  { %p253_p9 = pnand %p251_p8, %p248_p7 }
 0x10f   :  { %256 = shalt.err (!%p253_p9)
}
 0x110   :  { %151 = dma.vmem_to_hbm [thread:$0]  %s146_s12, 256, %s339_s3, [#allocation4], %s264_s22, %s264_s22, %s265_s23  }
 0x111   :  { %261 = dma.done.wait [#allocation4], 256  }
 0x112   :  { %262 = vsyncadd [#allocation4], 4294967040 }
 0x113   :  { %155 = vsyncpa [#allocation3], 1 }
 0x114   :  { %156 = vsyncpa [#allocation6], 1 }
 0x115   :  { %157 = vsyncpa [#allocation4], 1 }

</bundles_post_ra>
